<compile_context>
chip_gen: v7x
topology: tpu7x:2x2x1
jax: 0.10.0
libtpu: 0.0.40
codegen_flags: <defaults>
</compile_context>

<pallas_src>
import jax
import jax.numpy as jnp
from jax.experimental import pallas as pl
from jax.experimental.pallas import tpu as pltpu


def _round_up(x, m):
    return ((x + m - 1) // m) * m


def _device_kind():
    try:
        return jax.devices()[0].device_kind.lower()
    except Exception:
        return ""


def _vmem_budget_bytes():
    """Per-TensorCore VMEM budget with headroom (v7x: 64 MiB/TC; v5e/v6e: 128 MiB)."""
    try:
        cap = int(pltpu.get_tpu_info().vmem_capacity_bytes)
    except Exception:
        cap = 128 * 1024 * 1024
    return int(min(cap * 0.80, 110 * 1024 * 1024))


def _spec(block_shape, index_map, buffer_count=None):
    """BlockSpec; constant-index blocks can request single-buffering."""
    if buffer_count is not None:
        try:
            return pl.BlockSpec(block_shape, index_map,
                                pipeline_mode=pl.Buffered(buffer_count))
        except Exception:
            pass  # older API without pipeline_mode: fall back to default buffering
    return pl.BlockSpec(block_shape, index_map)


# --------------------------- kernels ---------------------------------------

def _resident_glu_kernel(ew_dtype):
    def kernel(adj_ref, xl_ref, xr_ref, bl_ref, br_ref, o_ref):
        a = adj_ref[...]
        lhs = jnp.dot(a, xl_ref[...], preferred_element_type=jnp.float32) + bl_ref[...]
        rhs = jnp.dot(a, xr_ref[...], preferred_element_type=jnp.float32) + br_ref[...]
        lhs = lhs.astype(ew_dtype)
        rhs = rhs.astype(ew_dtype)
        o_ref[...] = (lhs * jax.nn.sigmoid(rhs)).astype(o_ref.dtype)
    return kernel


def _resident_relu_kernel():
    def kernel(adj_ref, xw_ref, b_ref, o_ref):
        h = jnp.dot(adj_ref[...], xw_ref[...],
                    preferred_element_type=jnp.float32) + b_ref[...]
        o_ref[...] = jnp.maximum(h, 0.0).astype(o_ref.dtype)
    return kernel


def _ktiled_glu_kernel(ew_dtype):
    def kernel(adj_ref, xl_ref, xr_ref, bl_ref, br_ref, o_ref, acc_l, acc_r):
        k = pl.program_id(1)

        @pl.when(k == 0)
        def _init():
            acc_l[...] = jnp.zeros_like(acc_l)
            acc_r[...] = jnp.zeros_like(acc_r)

        a = adj_ref[...]
        acc_l[...] += jnp.dot(a, xl_ref[...], preferred_element_type=jnp.float32)
        acc_r[...] += jnp.dot(a, xr_ref[...], preferred_element_type=jnp.float32)

        @pl.when(k == pl.num_programs(1) - 1)
        def _finalize():
            lhs = (acc_l[...] + bl_ref[...]).astype(ew_dtype)
            rhs = (acc_r[...] + br_ref[...]).astype(ew_dtype)
            o_ref[...] = (lhs * jax.nn.sigmoid(rhs)).astype(o_ref.dtype)
    return kernel


def _ktiled_relu_kernel():
    def kernel(adj_ref, xw_ref, b_ref, o_ref, acc):
        k = pl.program_id(1)

        @pl.when(k == 0)
        def _init():
            acc[...] = jnp.zeros_like(acc)

        acc[...] += jnp.dot(adj_ref[...], xw_ref[...],
                            preferred_element_type=jnp.float32)

        @pl.when(k == pl.num_programs(1) - 1)
        def _finalize():
            o_ref[...] = jnp.maximum(acc[...] + b_ref[...], 0.0).astype(o_ref.dtype)
    return kernel


# --------------------------- wrapper ----------------------------------------

def prepare_adjacency(adj, mask=None, compute_dtype=jnp.bfloat16):
    """Hoist the static adjacency preprocessing (mask fold + dtype cast) out of
    the per-call path.  STSGCN reuses the same adj/mask across layers and
    timesteps: call this once, cache the result, and pass it as `adj` with
    mask=None to gcn_operation."""
    cdt = jnp.dtype(compute_dtype)
    a = adj if mask is None else adj * mask
    return a.astype(cdt)


def gcn_operation(x, adj, weight, bias, out_dim, activation="GLU", mask=None,
                  tm=256, tk=None, compute_dtype=jnp.bfloat16, resident="auto"):
    """
    x:      (M, B, Cin)   with M = 3*num_vertices
    adj:    (M, M)        (optionally already prepared via prepare_adjacency)
    weight: (Cin, k*Cout) with k = 2 for GLU, 1 for relu (Linear weight, transposed)
    bias:   (k*Cout,)
    mask:   optional (M, M); folded into adj once (outside the kernel)
    returns (M, B, Cout) in x.dtype
    """
    assert activation in ("GLU", "relu")
    M, B, Cin = x.shape
    Cout = out_dim
    k_mul = 2 if activation == "GLU" else 1
    assert weight.shape == (Cin, k_mul * Cout)
    assert bias.shape == (k_mul * Cout,)

    out_dtype = x.dtype
    cdt = jnp.dtype(compute_dtype) if compute_dtype is not None else jnp.dtype(x.dtype)
    esz = cdt.itemsize
    out_esz = jnp.dtype(out_dtype).itemsize

    kind = _device_kind()
    is_v5e = ("v5e" in kind) or ("v5 lite" in kind) or ("v5lite" in kind)
    is_v7 = "v7" in kind
    # GLU/relu elementwise dtype: bf16 on v6e/v7x (native bf16 VPU/EUP), f32 on v5e.
    ew_dtype = jnp.float32 if (cdt == jnp.float32 or is_v5e) else jnp.bfloat16

    budget = _vmem_budget_bytes()

    # ---- static adjacency preprocessing (hoistable via prepare_adjacency) ----
    adj_eff = adj if mask is None else adj * mask      # fold mask ONCE, not per k-step
    adj_eff = adj_eff.astype(cdt)

    # ---- wrapper-side FC fold:  FC(adj @ x) == adj @ (x @ W) + b -------------
    # TODO(synk): on MXU-bound v5e with Cin >= 128 and 2*Cout >> Cin, the
    # un-folded order (adj@x, then FC) has fewer MXU flops; not implemented here.
    xw = jnp.einsum("mbc,ck->mbk", x.astype(cdt), weight.astype(cdt),
                    preferred_element_type=jnp.float32)
    if activation == "GLU":
        parts = (xw[..., :Cout], xw[..., Cout:])
        bparts = (bias[:Cout], bias[Cout:])
    else:
        parts = (xw,)
        bparts = (bias,)

    N = B * Cout
    Np = _round_up(N, 128)          # lane-dense output width (no-op when N%128==0)

    def _pad2(a2, rows_to, cols_to):
        pr, pc = rows_to - a2.shape[0], cols_to - a2.shape[1]
        return a2 if (pr == 0 and pc == 0) else jnp.pad(a2, ((0, pr), (0, pc)))

    def _bias_row(b):
        v = jnp.tile(b.astype(jnp.float32), B)         # column j -> bias[j % Cout]
        if Np != N:
            v = jnp.pad(v, (0, Np - N))
        return v.reshape(1, Np)

    b_p = [_bias_row(b) for b in bparts]

    # ---- row tile: large, but guarantee >=2 tiles so both v7x TCs get work ----
    tm_eff = max(16, (min(tm, _round_up(M, 16)) // 16) * 16)
    while tm_eff > 16 and _round_up(M, tm_eff) // tm_eff < 2:
        tm_eff = max(16, (tm_eff // 2) // 16 * 16)
    Mp_r = _round_up(M, tm_eff)

    # ---- path selection: VMEM-resident xw (no K axis) vs. K-tiled fallback ----
    Mp_k_res = _round_up(M, 128)
    resident_bytes = (k_mul * Mp_k_res * Np * esz        # xw halves, single-buffered
                      + 2 * tm_eff * Mp_k_res * esz      # adj tiles (double buffer)
                      + k_mul * Np * 4                   # bias rows
                      + 2 * tm_eff * Np * out_esz        # output tiles (double buffer)
                      + 2 * k_mul * tm_eff * Np * 4)     # f32 matmul temporaries
    use_resident = resident if isinstance(resident, bool) else resident_bytes <= budget

    if use_resident:
        Mp_k = Mp_k_res
        adj_p = _pad2(adj_eff, Mp_r, Mp_k)
        xw_p = [_pad2(p.reshape(M, N).astype(cdt), Mp_k, Np) for p in parts]

        grid = (Mp_r // tm_eff,)
        in_specs = [pl.BlockSpec((tm_eff, Mp_k), lambda i: (i, 0))]
        inputs = [adj_p]
        for xp in xw_p:                                    # resident, fetched once
            in_specs.append(_spec((Mp_k, Np), lambda i: (0, 0), buffer_count=1))
            inputs.append(xp)
        for bp in b_p:                                     # tiny, constant
            in_specs.append(_spec((1, Np), lambda i: (0, 0), buffer_count=1))
            inputs.append(bp)
        out_spec = pl.BlockSpec((tm_eff, Np), lambda i: (i, 0))
        scratch = []
        dim_sem = ("parallel",)
        kernel = (_resident_glu_kernel(ew_dtype) if activation == "GLU"
                  else _resident_relu_kernel())
        bytes_acc = (adj_p.size * esz + sum(p.size for p in xw_p) * esz
                     + k_mul * Np * 4 + Mp_r * Np * out_esz)
    else:
        if tk is None:
            tk = 256 if is_v7 else 512    # deeper K runs on v5e/v6e (1 vst slot on v5e)
        tk_eff = max(128, (min(tk, _round_up(M, 128)) // 128) * 128)
        Mp_k = _round_up(M, tk_eff)
        adj_p = _pad2(adj_eff, Mp_r, Mp_k)
        xw_p = [_pad2(p.reshape(M, N).astype(cdt), Mp_k, Np) for p in parts]

        grid = (Mp_r // tm_eff, Mp_k // tk_eff)
        in_specs = [pl.BlockSpec((tm_eff, tk_eff), lambda i, kk: (i, kk))]
        inputs = [adj_p]
        for xp in xw_p:                                    # streamed K tiles
            in_specs.append(pl.BlockSpec((tk_eff, Np), lambda i, kk: (kk, 0)))
            inputs.append(xp)
        for bp in b_p:
            in_specs.append(_spec((1, Np), lambda i, kk: (0, 0), buffer_count=1))
            inputs.append(bp)
        out_spec = pl.BlockSpec((tm_eff, Np), lambda i, kk: (i, 0))
        scratch = [pltpu.VMEM((tm_eff, Np), jnp.float32) for _ in range(k_mul)]
        dim_sem = ("parallel", "arbitrary")
        kernel = (_ktiled_glu_kernel(ew_dtype) if activation == "GLU"
                  else _ktiled_relu_kernel())
        n_row = grid[0]
        bytes_acc = (adj_p.size * esz + sum(p.size for p in xw_p) * esz * n_row
                     + k_mul * Np * 4 + Mp_r * Np * out_esz)

    flops = 2 * Mp_r * Mp_k * Np * k_mul
    transc = Mp_r * Np if activation == "GLU" else 0
    cost = pl.CostEstimate(flops=int(flops), transcendentals=int(transc),
                           bytes_accessed=int(bytes_acc))

    out_p = pl.pallas_call(
        kernel,
        out_shape=jax.ShapeDtypeStruct((Mp_r, Np), out_dtype),
        grid_spec=pltpu.PrefetchScalarGridSpec(
            num_scalar_prefetch=0,
            grid=grid,
            in_specs=in_specs,
            out_specs=out_spec,
            scratch_shapes=scratch),
        compiler_params=pltpu.CompilerParams(
            dimension_semantics=dim_sem,
            vmem_limit_bytes=budget),
        cost_estimate=cost,
    )(*inputs)

    out = out_p
    if Mp_r != M or Np != N:
        out = out[:M, :N]
    return out.reshape(M, B, Cout)


# --------------------------- reference & test --------------------------------

def _reference(x, adj, weight, bias, out_dim, activation="GLU", mask=None):
    if mask is not None:
        adj = adj * mask
    ax = jnp.einsum("nm,mbc->nbc", adj, x)
    h = ax @ weight + bias
    if activation == "GLU":
        lhs, rhs = h[..., :out_dim], h[..., out_dim:]
        return lhs * jax.nn.sigmoid(rhs)
    return jnp.maximum(h, 0.0)


if __name__ == "__main__":
    key = jax.random.PRNGKey(0)

    # ---- config 1: GLU + mask, M = 3*16 = 48, B=2, Cin=4, Cout=8 ----
    num_vertices = 16
    M = 3 * num_vertices
    B, in_dim, out_dim = 2, 4, 8
    dtype = jnp.float32

    k_x, k_adj, k_w, k_b, k_m = jax.random.split(key, 5)
    x = jax.random.normal(k_x, (M, B, in_dim), dtype=dtype)
    adj = jax.random.normal(k_adj, (M, M), dtype=dtype) * 0.1
    mask = (jax.random.uniform(k_m, (M, M)) > 0.2).astype(dtype)
    weight = jax.random.normal(k_w, (in_dim, 2 * out_dim), dtype=dtype) * 0.1
    bias = jax.random.normal(k_b, (2 * out_dim,), dtype=dtype) * 0.1

    ref = _reference(x, adj, weight, bias, out_dim, activation="GLU", mask=mask)

    # f32 compute path (auto -> resident fast path at this size): tight tolerance.
    out_f32 = jax.block_until_ready(
        gcn_operation(x, adj, weight, bias, out_dim, activation="GLU",
                      mask=mask, compute_dtype=jnp.float32))
    assert out_f32.shape == (M, B, out_dim)
    assert jnp.allclose(out_f32, ref, atol=1e-4, rtol=1e-4)

    # Default bf16 fast path, adjacency pre-folded/cast once (as a caller would cache).
    adj_prep = prepare_adjacency(adj, mask, compute_dtype=jnp.bfloat16)
    out_bf16 = jax.block_until_ready(
        gcn_operation(x, adj_prep, weight, bias, out_dim, activation="GLU"))
    assert jnp.allclose(out_bf16, ref, atol=5e-2, rtol=5e-2)

    # relu branch, B*Cout = 128 -> exercises the no-pad / no-slice lane-dense path.
    B2 = 16
    x2 = jax.random.normal(jax.random.fold_in(key, 7), (M, B2, in_dim), dtype=dtype)
    w_r = weight[:, :out_dim]
    b_r = bias[:out_dim]
    ref_r = _reference(x2, adj, w_r, b_r, out_dim, activation="relu")
    out_r = jax.block_until_ready(
        gcn_operation(x2, adj, w_r, b_r, out_dim, activation="relu",
                      compute_dtype=jnp.float32))
    assert jnp.allclose(out_r, ref_r, atol=1e-4, rtol=1e-4)

    # K-tiled fallback path (forced), multiple K steps: M = 3*48 = 144, tk=128.
    M3 = 3 * 48
    k3 = jax.random.fold_in(key, 13)
    ka, kx3, km3 = jax.random.split(k3, 3)
    x3 = jax.random.normal(kx3, (M3, B, in_dim), dtype=dtype)
    adj3 = jax.random.normal(ka, (M3, M3), dtype=dtype) * 0.05
    mask3 = (jax.random.uniform(km3, (M3, M3)) > 0.2).astype(dtype)
    ref3 = _reference(x3, adj3, weight, bias, out_dim, activation="GLU", mask=mask3)
    out3 = jax.block_until_ready(
        gcn_operation(x3, adj3, weight, bias, out_dim, activation="GLU",
                      mask=mask3, compute_dtype=jnp.float32,
                      resident=False, tm=64, tk=128))
    assert jnp.allclose(out3, ref3, atol=1e-4, rtol=1e-4)

    print("KERNEL_OK")
</pallas_src>

<mosaic_0001>
module attributes {stable_mosaic.version = 11 : i64} {
  func.func @kernel(%arg0: i32, %arg1: memref<16x128xf32, #tpu.memory_space<vmem>>, %arg2: memref<128x128xf32, #tpu.memory_space<vmem>>, %arg3: memref<128x128xf32, #tpu.memory_space<vmem>>, %arg4: memref<1x128xf32, #tpu.memory_space<vmem>>, %arg5: memref<1x128xf32, #tpu.memory_space<vmem>>, %arg6: memref<16x128xf32, #tpu.memory_space<vmem>>) attributes {dimension_semantics = [#tpu.dimension_semantics<parallel>], iteration_bounds = array<i64: 3>, scalar_prefetch = 0 : i64, scratch_operands = 0 : i64, tpu.core_type = #tpu.core_type<tc>, window_params = [{transform_indices = @transform_0, window_bounds = array<i64: 16, 128>}, {pipeline_mode = #tpu.pipeline_mode<synchronous>, transform_indices = @transform_1, window_bounds = array<i64: 128, 128>}, {pipeline_mode = #tpu.pipeline_mode<synchronous>, transform_indices = @transform_2, window_bounds = array<i64: 128, 128>}, {pipeline_mode = #tpu.pipeline_mode<synchronous>, transform_indices = @transform_3, window_bounds = array<i64: 1, 128>}, {pipeline_mode = #tpu.pipeline_mode<synchronous>, transform_indices = @transform_4, window_bounds = array<i64: 1, 128>}, {transform_indices = @transform_5, window_bounds = array<i64: 16, 128>}]} {
    %c0 = arith.constant 0 : index
    %c0_0 = arith.constant 0 : index
    %0 = vector.load %arg1[%c0, %c0_0] : memref<16x128xf32, #tpu.memory_space<vmem>>, vector<16x128xf32>
    %c0_1 = arith.constant 0 : index
    %c0_2 = arith.constant 0 : index
    %1 = vector.load %arg2[%c0_1, %c0_2] : memref<128x128xf32, #tpu.memory_space<vmem>>, vector<128x128xf32>
    %cst = arith.constant dense<0.000000e+00> : vector<16x128xf32>
    %2 = tpu.matmul %0, %1, %cst {dimension_numbers = #tpu.dot_dimension_numbers<[1], [0], [0], [1], [0, 0, 1, 1], [], []>} : vector<16x128xf32>, vector<128x128xf32>, vector<16x128xf32> -> vector<16x128xf32>
    %c0_3 = arith.constant 0 : index
    %c0_4 = arith.constant 0 : index
    %3 = vector.load %arg4[%c0_3, %c0_4] : memref<1x128xf32, #tpu.memory_space<vmem>>, vector<1x128xf32>
    %4 = vector.broadcast %3 : vector<1x128xf32> to vector<16x128xf32>
    %5 = arith.addf %2, %4 : vector<16x128xf32>
    %c0_5 = arith.constant 0 : index
    %c0_6 = arith.constant 0 : index
    %6 = vector.load %arg3[%c0_5, %c0_6] : memref<128x128xf32, #tpu.memory_space<vmem>>, vector<128x128xf32>
    %cst_7 = arith.constant dense<0.000000e+00> : vector<16x128xf32>
    %7 = tpu.matmul %0, %6, %cst_7 {dimension_numbers = #tpu.dot_dimension_numbers<[1], [0], [0], [1], [0, 0, 1, 1], [], []>} : vector<16x128xf32>, vector<128x128xf32>, vector<16x128xf32> -> vector<16x128xf32>
    %c0_8 = arith.constant 0 : index
    %c0_9 = arith.constant 0 : index
    %8 = vector.load %arg5[%c0_8, %c0_9] : memref<1x128xf32, #tpu.memory_space<vmem>>, vector<1x128xf32>
    %9 = vector.broadcast %8 : vector<1x128xf32> to vector<16x128xf32>
    %10 = arith.addf %7, %9 : vector<16x128xf32>
    %11 = arith.negf %10 : vector<16x128xf32>
    %12 = math.exp %11 : vector<16x128xf32>
    %cst_10 = arith.constant 1.000000e+00 : f32
    %13 = vector.broadcast %cst_10 : f32 to vector<16x128xf32>
    %14 = arith.addf %13, %12 : vector<16x128xf32>
    %15 = arith.divf %13, %14 : vector<16x128xf32>
    %16 = arith.mulf %5, %15 : vector<16x128xf32>
    %c0_11 = arith.constant 0 : index
    %c0_12 = arith.constant 0 : index
    %17 = vector.load %arg6[%c0_11, %c0_12] : memref<16x128xf32, #tpu.memory_space<vmem>>, vector<16x128xf32>
    tpu.vector_store %arg6[%c0_11, %c0_12], %16 {strides = array<i32>} : memref<16x128xf32, #tpu.memory_space<vmem>>, vector<16x128xf32>,
    return
  }
  func.func @transform_0(%arg0: i32) -> (i32, i32) {
    %c0_i32 = arith.constant 0 : i32
    %c0_i32_0 = arith.constant 0 : i32
    return %arg0, %c0_i32 : i32, i32
  }
  func.func @transform_1(%arg0: i32) -> (i32, i32) {
    %c0_i32 = arith.constant 0 : i32
    %c0_i32_0 = arith.constant 0 : i32
    %c0_i32_1 = arith.constant 0 : i32
    return %c0_i32, %c0_i32_0 : i32, i32
  }
  func.func @transform_2(%arg0: i32) -> (i32, i32) {
    %c0_i32 = arith.constant 0 : i32
    %c0_i32_0 = arith.constant 0 : i32
    %c0_i32_1 = arith.constant 0 : i32
    return %c0_i32, %c0_i32_0 : i32, i32
  }
  func.func @transform_3(%arg0: i32) -> (i32, i32) {
    %c0_i32 = arith.constant 0 : i32
    %c0_i32_0 = arith.constant 0 : i32
    %c0_i32_1 = arith.constant 0 : i32
    return %c0_i32, %c0_i32_0 : i32, i32
  }
  func.func @transform_4(%arg0: i32) -> (i32, i32) {
    %c0_i32 = arith.constant 0 : i32
    %c0_i32_0 = arith.constant 0 : i32
    %c0_i32_1 = arith.constant 0 : i32
    return %c0_i32, %c0_i32_0 : i32, i32
  }
  func.func @transform_5(%arg0: i32) -> (i32, i32) {
    %c0_i32 = arith.constant 0 : i32
    %c0_i32_0 = arith.constant 0 : i32
    return %arg0, %c0_i32 : i32, i32
  }
}

</mosaic_0001>

<bundles_post_ra>
// kernel: tpu_custom_call.1
= control target key start
LH: loop header
LB: loop body
LE: loop exit
PB: predicated region body
PF: predicated region fallthrough
CT: control target
= control target key end

     0   :  { %10 = vsyncpa [#allocation3], 0  ;;  %s1486_s0 = inlined_call_operand.hbm [shape: f32[48,128], index: 0, kind: input, shape index: {}]   ;;  %s1487_s1 = inlined_call_operand.hbm [shape: f32[128,128], index: 1, kind: input, shape index: {}]   ;;  %s1488_s2 = inlined_call_operand.hbm [shape: f32[128,128], index: 2, kind: input, shape index: {}]   ;;  %s1489_s3 = inlined_call_operand.hbm [shape: f32[1,128], index: 3, kind: input, shape index: {}]   ;;  %s1490_s4 = inlined_call_operand.hbm [shape: f32[1,128], index: 4, kind: input, shape index: {}]   ;;  %s1491_s5 = inlined_call_operand.hbm [shape: f32[48,128], index: 5, kind: output, shape index: {}]  }
   0x1   :  { %12 = vsyncpa [#allocation3 + $0x1], 0 }
   0x2   :  { %13 = vsyncpa [#allocation6], 0 }
   0x3   :  { %14 = vsyncpa [#allocation9], 0 }
   0x4   :  { %15 = vsyncpa [#allocation4], 0 }
   0x5   :  { %17 = vsyncpa [#allocation4 + $0x1], 0  ;;  %s1193_s18 = smov 0   ;;  %s1195_s19 = smov 0  }
   0x6   :  { %s1197_s20 = smov 0   ;;  %s1199_s21 = smov 0  }
   0x7 LB: > { %s1214_s22 = sadd.s32 4294967295, %s1151_s21   ;;  %s638_s23 = sadd.s32 4294967294, %s1151_s21   ;;  %s1151_s21 = sphi %s1199_s21, %s1513_s21   ;;  %s1147_s20 = sphi %s1197_s20, %s1512_s20   ;;  %s1143_s19 = sphi %s1195_s19, %s1511_s19   ;;  %s1139_s18 = sphi %s1193_s18, %s1510_s18  }
   0x8   : > { %p43_p0 = scmp.ne.s32.totalorder %s1143_s19, %s1139_s18  ;;  %p1492_p1 = scmp.eq.s32.totalorder %s1214_s22, 0 }
   0x9   : > { %p157_p3 = scmp.eq.s32.totalorder %s638_s23, 2  ;;  %p639_p5 = scmp.ge.s32.totalorder %s1151_s21, 1 }
   0xa   : > { %p1223_p4 = por %p1492_p1, %p43_p0  ;;  %p164_p7 = scmp.lt.s32.totalorder %s1151_s21, 4 }
   0xb   : > { %p1228_p6 = por %p157_p3, %p43_p0  ;;  %s1153_s27 = smov [#allocation5]  }
   0xc   : > { %s1495_s24 = scalar_select %p1223_p4, 1, 0 }
   0xd   : > { %s1496_s25 = scalar_select %p1228_p6, 1, 0 }
   0xe   : > { %p1233_p8 = pnand %p639_p5, %p164_p7  ;;  %s176_s28 = sshll.u32 %s1153_s27, 4  ;;  %s1237_s28 = int_to_ptr.vmem [resolvable:$true] %s176_s28 }
   0xf   : > { %s1154_s30 = smov [#allocation8]   ;;  %s1155_s7 = smov [#allocation7]  }
  0x10   : > { %s1497_s26 = scalar_select %p1233_p8, 1, 0 }
  0x11   : > { %p856_p9 = pneg %p1233_p8  ;;  %s203_s6 = sshll.u32 %s1154_s30, 4  ;;  %s1247_s6 = int_to_ptr.vmem [resolvable:$true] %s203_s6 }
  0x12   : > { %s1249_s8 = sshll.u32 %s1155_s7, 4  ;;  %s935_s11 = scalar_lea.hbm %s1487_s1, 2048  ;;  %s190_s8 = int_to_ptr.vmem [resolvable:$true] %s1249_s8 }
  0x13   : > { %p1243_p10 = pnand %p856_p9, %p1492_p1  ;;  %p936_p11 = scmp.ne.s32.totalorder %s1487_s1, %s935_s11 }
  0x14   : > { %p942_p3 = scmp.lt.u32.totalorder %s935_s11, %s1487_s1 }
  0x15   : > { %p1259_p12 = pneg %p1243_p10 }
  0x17   : > { %p938_p13 = pnand %p1259_p12, %p936_p11 }
  0x19   : > { %p939_p0 = pneg %p938_p13 }
  0x1b   : > { %p944_p5 = pnand %p942_p3, %p939_p0 }
  0x1d   : > { %947 = shalt.err (!%p944_p5)
}
  0x1e   : > { %s948_s17 = scalar_lea.vmem %s1237_s28, 2048  ;;  %p956_p2 = scmp.lt.s32.totalorder %s1237_s28, %s1237_s28 }
  0x1f   : > { %p949_p7 = scmp.ne.s32.totalorder %s1237_s28, %s948_s17  ;;  %p957_p6 = scmp.lt.s32.totalorder %s948_s17, %s948_s17 }
  0x21   : > { %p951_p9 = pnand %p949_p7, %p1259_p12  ;;  %p958_p11 = por %p957_p6, %p956_p2 }
  0x23   : > { %p952_p1 = pneg %p951_p9 }
  0x25   : > { %p959_p13 = pnand %p958_p11, %p952_p1 }
  0x27   : > { %962 = shalt.err (!%p959_p13)
}
  0x28   : > { %s1156_s23 = smov 128   ;;  %s1157_s27 = smov 8  }
  0x29   : > { %859 = dma.hbm_to_vmem [thread:$0]  (!%p1243_p10), %s1487_s1, 2048, %s1237_s28, [#allocation6], %s1156_s23, %s1156_s23, %s1157_s27  }
  0x2a   : > { %s963_s11 = scalar_lea.hbm %s1489_s3, 16 }
  0x2b   : > { %p964_p1 = scmp.ne.s32.totalorder %s1489_s3, %s963_s11  ;;  %p970_p0 = scmp.lt.u32.totalorder %s963_s11, %s1489_s3 }
  0x2d   : > { %p966_p2 = pnand %p964_p1, %p1259_p12 }
  0x2f   : > { %p967_p6 = pneg %p966_p2 }
  0x31   : > { %p972_p3 = pnand %p970_p0, %p967_p6 }
  0x33   : > { %975 = shalt.err (!%p972_p3)
}
  0x34   : > { %s976_s28 = scalar_lea.vmem %s1247_s6, 16  ;;  %s983_s17 = scalar_lea.vmem %s1247_s6, 32 }
  0x35   : > { %p977_p5 = scmp.ne.s32.totalorder %s1247_s6, %s976_s28  ;;  %p984_p11 = scmp.lt.s32.totalorder %s1247_s6, %s1247_s6 }
  0x36   : > { %p985_p13 = scmp.lt.s32.totalorder %s983_s17, %s976_s28 }
  0x37   : > { %p979_p7 = pnand %p977_p5, %p1259_p12 }
  0x38   : > { %p986_p1 = por %p985_p13, %p984_p11 }
  0x39   : > { %p980_p9 = pneg %p979_p7 }
  0x3b   : > { %p987_p2 = pnand %p986_p1, %p980_p9 }
  0x3d   : > { %990 = shalt.err (!%p987_p2)
}
  0x3e   : > { %865 = dma.hbm_to_vmem [thread:$0]  (!%p1243_p10), %s1489_s3, 16, %s1247_s6, [#allocation9]  }
  0x3f   : > { %s991_s11 = scalar_lea.hbm %s1488_s2, 2048 }
  0x40   : > { %p992_p6 = scmp.ne.s32.totalorder %s1488_s2, %s991_s11  ;;  %p998_p5 = scmp.lt.u32.totalorder %s991_s11, %s1488_s2 }
  0x42   : > { %p994_p0 = pnand %p992_p6, %p1259_p12 }
  0x44   : > { %p995_p3 = pneg %p994_p0 }
  0x46   : > { %p1000_p7 = pnand %p998_p5, %p995_p3 }
  0x48   : > { %1003 = shalt.err (!%p1000_p7)
}
  0x49   : > { %s1004_s28 = scalar_lea.vmem %s190_s8, 2048  ;;  %p1012_p1 = scmp.lt.s32.totalorder %s190_s8, %s190_s8 }
  0x4a   : > { %p1005_p9 = scmp.ne.s32.totalorder %s190_s8, %s1004_s28  ;;  %p1013_p2 = scmp.lt.s32.totalorder %s1004_s28, %s1004_s28 }
  0x4c   : > { %p1007_p11 = pnand %p1005_p9, %p1259_p12  ;;  %p1014_p4 = por %p1013_p2, %p1012_p1 }
  0x4e   : > { %p1008_p13 = pneg %p1007_p11 }
  0x50   : > { %p1015_p8 = pnand %p1014_p4, %p1008_p13 }
  0x52   : > { %1018 = shalt.err (!%p1015_p8)
}
  0x53   : > { %862 = dma.hbm_to_vmem [thread:$0]  (!%p1243_p10), %s1488_s2, 2048, %s190_s8, [#allocation6], %s1156_s23, %s1156_s23, %s1157_s27  }
  0x54   : > { %s1158_s30 = smov [#allocation10]   ;;  %s1019_s11 = scalar_lea.hbm %s1490_s4, 16 }
  0x55   : > { %s214_s7 = sshll.u32 %s1158_s30, 4  ;;  %p1020_p4 = scmp.ne.s32.totalorder %s1490_s4, %s1019_s11  ;;  %s215_s7 = int_to_ptr.vmem [resolvable:$true] %s214_s7 }
  0x56   : > { %p1026_p0 = scmp.lt.u32.totalorder %s1019_s11, %s1490_s4 }
  0x57   : > { %p1022_p8 = pnand %p1020_p4, %p1259_p12 }
  0x59   : > { %p1023_p6 = pneg %p1022_p8 }
  0x5b   : > { %p1028_p3 = pnand %p1026_p0, %p1023_p6 }
  0x5d   : > { %1031 = shalt.err (!%p1028_p3)
}
  0x5e   : > { %s1032_s8 = scalar_lea.vmem %s215_s7, 16  ;;  %s1039_s28 = scalar_lea.vmem %s215_s7, 32 }
  0x5f   : > { %p1033_p5 = scmp.ne.s32.totalorder %s215_s7, %s1032_s8  ;;  %p1040_p11 = scmp.lt.s32.totalorder %s215_s7, %s215_s7 }
  0x60   : > { %p1041_p13 = scmp.lt.s32.totalorder %s1039_s28, %s1032_s8 }
  0x61   : > { %p1035_p7 = pnand %p1033_p5, %p1259_p12 }
  0x62   : > { %p1042_p1 = por %p1041_p13, %p1040_p11 }
  0x63   : > { %p1036_p9 = pneg %p1035_p7 }
  0x65   : > { %p1043_p2 = pnand %p1042_p1, %p1036_p9 }
  0x67   : > { %1046 = shalt.err (!%p1043_p2)
}
  0x68   : > { %868 = dma.hbm_to_vmem [thread:$0]  (!%p1243_p10), %s1490_s4, 16, %s215_s7, [#allocation9]  }
  0x69   : > { %s1348_s14 = sadd.s32 1, %s1151_s21   ;;  %s30_s30 = sadd.s32 1, %s1147_s20 }
  0x6a   : > { %s27_s29 = ssub.s32 %s1151_s21, %s1348_s14  ;;  %p37_p12 = scmp.ne.s32.totalorder %s1147_s20, %s1143_s19 }
  0x6b   : > { %p28_p4 = scmp.eq.s32.totalorder %s27_s29, 0  ;;  %p38_p8 = scmp.eq.s32.totalorder %s1151_s21, 0 }
  0x6c   : > { %p1500_p6 = scmp.eq.s32.totalorder %s1214_s22, 2  ;;  %p881_p3 = scmp.lt.s32.totalorder %s1151_s21, 3 }
  0x6d   : > { %s1364_s10 = scalar_select %p28_p4, %s1147_s20, %s30_s30  }
  0x6e   : > { %p1358_p0 = por %p1500_p6, %p37_p12  ;;  %p39_p5 = por %p38_p8, %p37_p12 }
  0x6f   : > { %s225_s11 = sand.u32 1, %s1147_s20   ;;  %s664_s7 = sshll.u32 %s1151_s21, 8 }
  0x70   : > { %s645_s12 = sshll.u32 %s225_s11, 4  ;;  %s1371_s16 = scalar_lea.hbm %s1486_s0, %s664_s7 }
  0x71   : > { %s229_s8 = scalar_lea.vmem [#allocation2], %s645_s12  ;;  %p1375_p10 = pnand %p881_p3, %p39_p5 }
  0x72   : > { %s236_s28 = sshll.u32 %s229_s8, 4  ;;  %s1379_s17 = scalar_lea.sflag [#allocation3], %s225_s11  ;;  %s1373_s28 = int_to_ptr.vmem [resolvable:$true] %s236_s28 }
  0x73   : > { %s1047_s30 = scalar_lea.hbm %s1371_s16, 256  ;;  %p1049_p9 = pneg %p1375_p10 }
  0x74   : > { %p1048_p7 = scmp.ne.s32.totalorder %s1371_s16, %s1047_s30  ;;  %s1052_s7 = scalar_lea.hbm %s1486_s0, 768 }
  0x75   : > { %p1053_p1 = scmp.lt.u32.totalorder %s1371_s16, %s1486_s0  ;;  %p1054_p2 = scmp.lt.u32.totalorder %s1052_s7, %s1047_s30 }
  0x76   : > { %p1050_p11 = pnand %p1049_p9, %p1048_p7  ;;  %p1056_p4 = scmp.lt.u32.totalorder %s1047_s30, %s1371_s16 }
  0x77   : > { %p1055_p12 = por %p1054_p2, %p1053_p1 }
  0x78   : > { %p1051_p13 = pneg %p1050_p11 }
  0x79   : > { %p1057_p8 = por %p1056_p4, %p1055_p12 }
  0x7b   : > { %p1058_p6 = pnand %p1057_p8, %p1051_p13 }
  0x7d   : > { %1061 = shalt.err (!%p1058_p6)
}
  0x7e   : > { %s1062_s11 = scalar_lea.vmem %s1373_s28, 256  ;;  %s1159_s8 = smov [#allocation2]  }
  0x7f   : > { %p1063_p3 = scmp.ne.s32.totalorder %s1373_s28, %s1062_s11  ;;  %s1067_s29 = sshll.u32 %s1159_s8, 4  ;;  %s1068_s29 = int_to_ptr.vmem [resolvable:$false] %s1067_s29 }
  0x80   : > { %s1069_s12 = scalar_lea.vmem %s1068_s29, 512  ;;  %p1070_p11 = scmp.lt.s32.totalorder %s1373_s28, %s1068_s29 }
  0x81   : > { %p1065_p5 = pnand %p1063_p3, %p1049_p9  ;;  %p1071_p1 = scmp.lt.s32.totalorder %s1069_s12, %s1062_s11 }
  0x83   : > { %p1066_p7 = pneg %p1065_p5  ;;  %p1072_p2 = por %p1071_p1, %p1070_p11 }
  0x85   : > { %p1073_p12 = pnand %p1072_p2, %p1066_p7 }
  0x87   : > { %1076 = shalt.err (!%p1073_p12)
}
  0x88   : > { %872 = dma.hbm_to_vmem [thread:$0]  (!%p1375_p10), %s1371_s16, 256, %s1373_s28, %s1379_s17, %s1156_s23, %s1156_s23, %s1157_s27  }
  0x89   : > { %p1503_p9 = scmp.ne.s32.totalorder %s1497_s26, 0 }
  0x8a   : > { %s1413_s30 = sand.u32 (!%p1503_p9), 1, %s1143_s19   ;;  %p1504_p13 = scmp.ne.s32.totalorder (!%p1503_p9), %s1495_s24, 0 }
  0x8b   : > { %248 = sbr.rel (%p1503_p9) target bundleno = 447 (0x1bf), region = 40  ;;  %s649_s7 = sshll.u32 (!%p1503_p9), %s1413_s30, 4 }
  0x8c   : > { %s251_s13 = scalar_lea.sflag (!%p1503_p9), [#allocation3], %s1413_s30  ;;  %s1419_s6 = scalar_lea.vmem (!%p1503_p9), [#allocation2], %s649_s7 }
  0x92   : > { %1122 = dma.done.wait (%p1504_p13), %s251_s13, 256  }
  0x93   : > { %1124 = vsyncadd (%p1504_p13), %s251_s13, 4294967040  ;;  %p1505_p10 = scmp.eq.s32.totalorder %s1214_s22, 0 }
  0x95   : > { %1126 = dma.done.wait (%p1505_p10), [#allocation6], 4096   ;;  %p1506_p4 = pmov %p1505_p10 }
  0x97   : > { %1128 = vsyncadd (%p1506_p4), [#allocation6], 4294963200  ;;  %p1507_p8 = pmov %p1506_p4 }
  0x98   : > { %p1508_p6 = pmov %p1506_p4 }
  0x99   : > { %1130 = dma.done.wait (%p1507_p8), [#allocation9], 32  }
  0x9a   : > { %1132 = vsyncadd (%p1508_p6), [#allocation9], 4294967264  ;;  %v399_v0 = vld [vmem:[#allocation7] sm:$0xff]  ;;  %v400_v1 = vld [vmem:[#allocation7 + $0x8] sm:$0xff]  ;;  %s296_s24 = scalar_lea.vmem [#allocation11], %s649_s7  ;;  %s665_s23 = sshll.u32 %s1214_s22, 8 }
  0x9b   : > { %v401_v2 = vld [vmem:[#allocation7 + $0x10] sm:$0xff]  ;;  %v804_v3 = vpack.c.bf16 %v400_v1, %v399_v0  ;;  %v402_v4 = vld [vmem:[#allocation7 + $0x18] sm:$0xff]  ;;  %v403_v6 = vld [vmem:[#allocation7 + $0x20] sm:$0xff]  ;;  %s527_s26 = sshll.u32 %s296_s24, 4  ;;  %s1443_s28 = scalar_lea.hbm %s1491_s5, %s665_s23  ;;  %s1438_s26 = int_to_ptr.vmem [resolvable:$true] %s527_s26 }
  0x9c   : > { %v808_v5 = vpack.c.bf16 %v402_v4, %v401_v2  ;;  %v404_v7 = vld [vmem:[#allocation7 + $0x28] sm:$0xff]  ;;  %v301_v8 = vld [vmem:[#allocation5] sm:$0xff]  ;;  %v405_v10 = vld [vmem:[#allocation7 + $0x30] sm:$0xff]  ;;  %s514_s17 = scalar_lea.sflag [#allocation4], %s1413_s30  ;;  %s1077_s15 = scalar_lea.vmem %s1438_s26, 256 }
  0x9d   : > { %805 = vmatprep.subr.bf16.mxu1 %v804_v3  ;;  %v812_v9 = vpack.c.bf16 %v404_v7, %v403_v6  ;;  %v406_v11 = vld [vmem:[#allocation7 + $0x38] sm:$0xff]  ;;  %v302_v12 = vld [vmem:[#allocation5 + $0x8] sm:$0xff]  ;;  %v303_v14 = vld [vmem:[#allocation5 + $0x10] sm:$0xff]  ;;  %p1078_p3 = scmp.ne.s32.totalorder %s1438_s26, %s1077_s15  ;;  %s1160_s22 = smov [#allocation11]  }
  0x9e   : > { %807 = vmatpush3.bf16.msra.mxu1 %v804_v3  ;;  %v772_v13 = vpack.c.bf16 %v302_v12, %v301_v8  ;;  %v304_v15 = vld [vmem:[#allocation5 + $0x18] sm:$0xff]  ;;  %v299_v16 = vld [vmem:[%s1419_s6] sm:$0xff]  ;;  %v306_v19 = vld [vmem:[#allocation5 + $0x28] sm:$0xff]  ;;  %v816_v20 = vpack.c.bf16 %v406_v11, %v405_v10  ;;  %s1081_s11 = sshll.u32 %s1160_s22, 4  ;;  %s1082_s11 = int_to_ptr.vmem [resolvable:$false] %s1081_s11 }
  0x9f   : > { %809 = vmatprep.subr.bf16.mxu1 %v808_v5  ;;  %v776_v17 = vpack.c.bf16 %v304_v15, %v303_v14  ;;  %769 = vmatprep.mubr.f32.mxu1 %v299_v16  ;;  %v305_v18 = vld [vmem:[#allocation5 + $0x20] sm:$0xff]  ;;  %v408_v22 = vld [vmem:[#allocation7 + $0x48] sm:$0xff]  ;;  %v307_v24 = vld [vmem:[#allocation5 + $0x30] sm:$0xff]  ;;  %p1079_p5 = pnand %p1078_p3, %p1358_p0  ;;  %s1083_s8 = scalar_lea.vmem %s1082_s11, 512 }
  0xa0   : > { %734 = vmatprep.mubr.f32.mxu0 %v299_v16  ;;  %773 = vmatprep.subr.bf16.mxu0 %v772_v13  ;;  %v407_v21 = vld [vmem:[#allocation7 + $0x40] sm:$0xff]  ;;  %v780_v23 = vpack.c.bf16 %v306_v19, %v305_v18  ;;  %v308_v25 = vld [vmem:[#allocation5 + $0x38] sm:$0xff]  ;;  %v409_v27 = vld [vmem:[#allocation7 + $0x50] sm:$0xff]  ;;  %p1084_p11 = scmp.lt.s32.totalorder %s1438_s26, %s1082_s11  ;;  %p1085_p1 = scmp.lt.s32.totalorder %s1083_s8, %s1077_s15 }
  0xa1   : > { %775 = vmatpush3.bf16.msra.mxu0 %v772_v13  ;;  %v820_v26 = vpack.c.bf16 %v408_v22, %v407_v21  ;;  %v410_v28 = vld [vmem:[#allocation7 + $0x58] sm:$0xff]  ;;  %v784_v29 = vpack.c.bf16 %v308_v25, %v307_v24  ;;  %v309_v30 = vld [vmem:[#allocation5 + $0x40] sm:$0xff]  ;;  %v310_v31 = vld [vmem:[#allocation5 + $0x48] sm:$0xff]  ;;  %p1080_p7 = pneg %p1079_p5 }
  0xa2   : > { %811 = vmatpush3.bf16.msra.mxu1 %v808_v5  ;;  %777 = vmatprep.subr.bf16.mxu0 %v776_v17  ;;  %v824_v32 = vpack.c.bf16 %v410_v28, %v409_v27  ;;  %v411_v33 = vld [vmem:[#allocation7 + $0x60] sm:$0xff]  ;;  %v412_v34 = vld [vmem:[#allocation7 + $0x68] sm:$0xff]  ;;  %v788_v35 = vpack.c.bf16 %v310_v31, %v309_v30  ;;  %v311_v36 = vld [vmem:[#allocation5 + $0x50] sm:$0xff]  ;;  %p1086_p2 = por %p1085_p1, %p1084_p11 }
  0xa3   : > { %813 = vmatprep.subr.bf16.mxu1 %v812_v9  ;;  %v312_v37 = vld [vmem:[#allocation5 + $0x58] sm:$0xff]  ;;  %v828_v38 = vpack.c.bf16 %v412_v34, %v411_v33  ;;  %v413_v39 = vld [vmem:[#allocation7 + $0x70] sm:$0xff]  ;;  %v313_v42 = vld [vmem:[#allocation5 + $0x60] sm:$0xff] }
  0xa4   : > { %v414_v40 = vld [vmem:[#allocation7 + $0x78] sm:$0xff]  ;;  %v792_v41 = vpack.c.bf16 %v312_v37, %v311_v36  ;;  %v314_v43 = vld [vmem:[#allocation5 + $0x68] sm:$0xff]  ;;  %v315_v46 = vld [vmem:[#allocation5 + $0x70] sm:$0xff]  ;;  %p1087_p12 = pnand %p1086_p2, %p1080_p7 }
  0xa5   : > { %779 = vmatpush3.bf16.msra.mxu0 %v776_v17  ;;  %v832_v44 = vpack.c.bf16 %v414_v40, %v413_v39  ;;  %v796_v45 = vpack.c.bf16 %v314_v43, %v313_v42  ;;  %v316_v47 = vld [vmem:[#allocation5 + $0x78] sm:$0xff]  ;;  %v656_v50 = vld [vmem:[#allocation10] ss:$0 sm:$0xff]  ;;  %v655_v63 = vld [vmem:[#allocation8] ss:$0 sm:$0xff] }
  0xa6   : > { %815 = vmatpush3.bf16.msra.mxu1 %v812_v9  ;;  %781 = vmatprep.subr.bf16.mxu0 %v780_v23  ;;  %v800_v48 = vpack.c.bf16 %v316_v47, %v315_v46  ;;  %v300_v49 = vld [vmem:[%s1419_s6 + $0x8] sm:$0xff] }
  0xa7   : > { %817 = vmatprep.subr.bf16.mxu1 %v816_v20 }
  0xa9   : > { %783 = vmatpush3.bf16.msra.mxu0 %v780_v23 }
  0xaa   : > { %819 = vmatpush3.bf16.msra.mxu1 %v816_v20  ;;  %785 = vmatprep.subr.bf16.mxu0 %v784_v29 }
  0xab   : > { %821 = vmatprep.subr.bf16.mxu1 %v820_v26 }
  0xad   : > { %787 = vmatpush3.bf16.msra.mxu0 %v784_v29 }
  0xae   : > { %823 = vmatpush3.bf16.msra.mxu1 %v820_v26  ;;  %789 = vmatprep.subr.bf16.mxu0 %v788_v35 }
  0xaf   : > { %825 = vmatprep.subr.bf16.mxu1 %v824_v32 }
  0xb1   : > { %791 = vmatpush3.bf16.msra.mxu0 %v788_v35 }
  0xb2   : > { %827 = vmatpush3.bf16.msra.mxu1 %v824_v32  ;;  %793 = vmatprep.subr.bf16.mxu0 %v792_v41 }
  0xb3   : > { %829 = vmatprep.subr.bf16.mxu1 %v828_v38 }
  0xb5   : > { %795 = vmatpush3.bf16.msra.mxu0 %v792_v41 }
  0xb6   : > { %831 = vmatpush3.bf16.msra.mxu1 %v828_v38  ;;  %797 = vmatprep.subr.bf16.mxu0 %v796_v45 }
  0xb7   : > { %833 = vmatprep.subr.bf16.mxu1 %v832_v44 }
  0xb9   : > { %799 = vmatpush3.bf16.msra.mxu0 %v796_v45 }
  0xba   : > { %835 = vmatpush3.bf16.msra.mxu1 %v832_v44  ;;  %801 = vmatprep.subr.bf16.mxu0 %v800_v48 }
  0xbd   : > { %770 = vmatmul.mubr.f32.vlgmr.msra.gmra.mrb[0].mxu1 %v300_v49  ;;  %803 = vmatpush3.bf16.msra.mxu0 %v800_v48 }
  0xc0   : > { %735 = vmatmul.mubr.f32.vlgmr.msra.gmra.mrb[0].mxu0 %v300_v49 }
 0x190   : > { %v771_v51 = vpop.f32.mrb[0].mxu1 }
 0x191   : > { %v494_v52 = vadd.f32 %v771_v51, %v656_v50  ;;  %v488_v53 = vpop.f32.mrb[1].mxu1 }
 0x192   : > { %v489_v54 = vadd.f32 %v656_v50, %v488_v53 }
 0x193   : > { %v658_v55 = vmul.f32 -1.442695, %v494_v52  ;;  %v736_v57 = vpop.f32.mrb[0].mxu0 }
 0x194   : > { %v657_v56 = vmul.f32 -1.442695, %v489_v54  ;;  %v390_v58 = vpop.f32.mrb[1].mxu0  ;;  %v396_v0 = vadd.f32 %v736_v57, %v655_v63 }
 0x195   : > { %927 = vpow2.f32 %v658_v55  ;;  %v391_v1 = vadd.f32 %v655_v63, %v390_v58 }
 0x196   : > { %929 = vpow2.f32 %v657_v56 }
 0x19f   : > { %v928_v59 = vpop.eup %927 }
 0x1a0   : > { %v930_v60 = vpop.eup %929  ;;  %v504_v61 = vadd.f32 1.0, %v928_v59 }
 0x1a1   : > { %v503_v62 = vadd.f32 1.0, %v930_v60 }
 0x1a2   : > { %931 = vrcp.f32 %v504_v61 }
 0x1a3   : > { %933 = vrcp.f32 %v503_v62 }
 0x1ac   : > { %v932_v2 = vpop.eup %931 }
 0x1ad   : > { %v934_v3 = vpop.eup %933  ;;  %v510_v4 = vmul.f32 %v932_v2, %v396_v0 }
 0x1ae   : > { %v509_v5 = vmul.f32 %v934_v3, %v391_v1 }
 0x1af   : > { %512 = vst [vmem:[%s296_s24 + $0x8] sm:$0xff] %v510_v4 }
 0x1b0   : > { %511 = vst [vmem:[%s296_s24] sm:$0xff] %v509_v5 }
 0x1b1   : > { %1090 = shalt.err (!%p1087_p12)
}
 0x1b2   : > { %s1091_s29 = scalar_lea.hbm %s1443_s28, 256  ;;  %s1095_s13 = scalar_lea.hbm %s1491_s5, 768 }
 0x1b3   : > { %p1092_p9 = scmp.ne.s32.totalorder %s1443_s28, %s1091_s29  ;;  %p1096_p4 = scmp.lt.u32.totalorder %s1443_s28, %s1491_s5 }
 0x1b4   : > { %p1097_p8 = scmp.lt.u32.totalorder %s1095_s13, %s1091_s29  ;;  %p1099_p3 = scmp.lt.u32.totalorder %s1091_s29, %s1443_s28 }
 0x1b5   : > { %p1093_p13 = pnand %p1092_p9, %p1358_p0 }
 0x1b6   : > { %p1098_p6 = por %p1097_p8, %p1096_p4 }
 0x1b7   : > { %p1094_p10 = pneg %p1093_p13 }
 0x1b8   : > { %p1100_p5 = por %p1099_p3, %p1098_p6 }
 0x1ba   : > { %p1101_p7 = pnand %p1100_p5, %p1094_p10 }
 0x1bc   : > { %1104 = shalt.err (!%p1101_p7)
}
 0x1bd   : > { %s1161_s23 = smov 128   ;;  %s1162_s27 = smov 8  }
 0x1be   : > { %854 = dma.vmem_to_hbm [thread:$0]  (%p1358_p0), %s1438_s26, 256, %s1443_s28, %s514_s17, %s1161_s23, %s1161_s23, %s1162_s27  }
 0x1bf PF: > { %p886_p11 = scmp.ge.s32.totalorder %s1151_s21, 2  ;;  %s542_s16 = sand.u32 1, %s1139_s18  }
 0x1c0   : > { %p1509_p1 = scmp.ne.s32.totalorder %s1496_s25, 0  ;;  %s543_s15 = scalar_lea.sflag [#allocation4], %s542_s16 }
 0x1c2   : > { %p874_p2 = pnand %p886_p11, %p1509_p1 }
 0x1c4   : > { %1134 = dma.done.wait (!%p874_p2), %s543_s15, 256  }
 0x1c5   : > { %1136 = vsyncadd (!%p874_p2), %s543_s15, 4294967040  ;;  %p20_p12 = scmp.ge.s32.totalorder %s1348_s14, 5   ;;  %s1510_s18 = smov %s1143_s19 }
 0x1c6   : > { %s1511_s19 = smov %s1147_s20  ;;  %s1512_s20 = smov %s1364_s10 }
 0x1c7   : > { %s1513_s21 = smov %s1348_s14  ;;  %22 = sbr.rel (!%p20_p12) target bundleno = 7 (0x7), region = 101 }
 0x1ce   :  { %548 = vsyncpa [#allocation3], 1 }
 0x1cf   :  { %550 = vsyncpa [#allocation3 + $0x1], 1 }
 0x1d0   :  { %551 = vsyncpa [#allocation6], 1 }
 0x1d1   :  { %552 = vsyncpa [#allocation9], 1 }
 0x1d2   :  { %553 = vsyncpa [#allocation4], 1 }
 0x1d3   :  { %555 = vsyncpa [#allocation4 + $0x1], 1 }

</bundles_post_ra>
